<compile_context>
chip_gen: v6e
topology: v6e:2x2x1
jax: 0.10.0
libtpu: 0.0.40
codegen_flags: <defaults>
</compile_context>

<pallas_src>
import functools

import jax
import jax.numpy as jnp
from jax.experimental import pallas as pl
from jax.experimental.pallas import tpu as pltpu

_NEG = -1e30  # finite "masked" score (avoids inf-inf NaNs in online softmax)


def _round_up(x, m):
    return ((x + m - 1) // m) * m


def _exp_dtype():
    """bf16 exponentials relieve the 1-wide EUP slot on v6e/v7x; v5e and older have no bf16 EUP."""
    try:
        kind = jax.devices()[0].device_kind.lower()
    except Exception:
        return jnp.float32
    if ("v6" in kind) or ("v7" in kind) or ("7x" in kind):
        return jnp.bfloat16
    return jnp.float32


# ---------------------------------------------------------------------------
# Kernel 1: fused projection.  z_ext = h @ W_ext in one MXU matmul.
# W_ext columns = [W_0 .. W_{H-1} | zero pad | W_h@a_l (H cols) | W_h@a_r (H cols) | pad].
# ---------------------------------------------------------------------------
def project_kernel(h_ref, w_ref, z_ref, s_ref, *, hf_pad):
    acc = jnp.dot(h_ref[...], w_ref[...], preferred_element_type=jnp.float32)
    z_ref[...] = acc[:, :hf_pad].astype(z_ref.dtype)   # projected feats (bf16, lane-dense)
    s_ref[...] = acc[:, hf_pad:]                       # [el | er] per head, f32


# ---------------------------------------------------------------------------
# Kernel 2: masked edge-softmax + aggregation, flash-style over (dst, src) tiles.
# Scalar-prefetched schedule: sid_ref (flattened [nb_dst, nb_src] gathered src-block ids),
# cnt_ref (#non-empty src blocks per dst block).
# ---------------------------------------------------------------------------
def gat_attn_kernel(sid_ref, cnt_ref, adj_ref, z_ref, sc_ref, elT_ref, out_ref,
                    m_sc, l_sc, acc_sc,
                    *, num_heads, out_feats, apply_elu, mean_heads, exp_dtype):
    di = pl.program_id(0)
    si = pl.program_id(1)
    n_src = pl.num_programs(1)

    @pl.when(si == 0)
    def _init():
        m_sc[...] = jnp.full_like(m_sc, _NEG)
        l_sc[...] = jnp.zeros_like(l_sc)
        acc_sc[...] = jnp.zeros_like(acc_sc)

    # Block-sparsity: only grid slots below the per-dst-block count carry edges; slots past the
    # count point at the same (already resident) block, so they cost neither DMA nor compute.
    @pl.when(si < cnt_ref[di])
    def _accumulate():
        mask = adj_ref[...] > 0            # (TD, TS) from int8 adjacency
        sc = sc_ref[...]                   # (TD, 128) f32, lanes [0,H)=el, [H,2H)=er
        el_t = elT_ref[...]                # (H, TS) f32, lane-oriented source term

        # TODO(synk): for num_heads >= 8 convert this static unroll to lax.fori_loop
        # (pl.ds lane slices) or an extra grid axis to bound the (TD,TS) temporaries' live ranges.
        for h in range(num_heads):
            er = sc[:, num_heads + h:num_heads + h + 1]       # (TD, 1) destination term
            el = el_t[h:h + 1, :]                             # (1, TS) source term (lane row)
            e = er + el                                       # pure VPU broadcast-add
            e = jnp.maximum(e, 0.2 * e)                       # leaky_relu(0.2): mul+max
            e = jnp.where(mask, e, _NEG)                      # single masking

            m_prev = m_sc[h]                                  # (TD, 1)
            m_new = jnp.maximum(m_prev, jnp.max(e, axis=1, keepdims=True))
            rescale = jnp.exp(m_prev - m_new)                 # tiny (TD,1), keep f32
            p = jnp.exp((e - m_new).astype(exp_dtype))        # bf16 EUP on v6e/v7x, f32 on v5e

            l_sc[h] = rescale * l_sc[h] + jnp.sum(p, axis=1, keepdims=True,
                                                  dtype=jnp.float32)
            z_h = z_ref[:, h * out_feats:(h + 1) * out_feats]  # (TS, F) bf16, per-head load
            pv = jnp.dot(p.astype(jnp.bfloat16), z_h,
                         preferred_element_type=jnp.float32)   # bf16 MXU, f32 accumulate
            acc_sc[h] = rescale * acc_sc[h] + pv               # lane-aligned scratch (offset 0)
            m_sc[h] = m_new

    @pl.when(si == n_src - 1)
    def _finalize():
        # Deferred normalization: one reciprocal per (dst row, head), once per dst tile.
        if mean_heads:
            res = None
            for h in range(num_heads):
                inv = pl.reciprocal(jnp.maximum(l_sc[h], 1e-9), approx=False)
                t = acc_sc[h] * inv
                res = t if res is None else res + t
            res = res * (1.0 / num_heads)
            if apply_elu:
                # TODO(synk): switch to jnp.expm1 once Mosaic lowering for expm1 is confirmed.
                res = jnp.where(res > 0, res, jnp.exp(res) - 1.0)
            out_ref[...] = res.astype(out_ref.dtype)            # single exact-width store
        else:
            out_ref[...] = jnp.zeros_like(out_ref)              # zero the 128-pad lanes once
            for h in range(num_heads):
                inv = pl.reciprocal(jnp.maximum(l_sc[h], 1e-9), approx=False)
                v = acc_sc[h] * inv
                if apply_elu:
                    v = jnp.where(v > 0, v, jnp.exp(v) - 1.0)
                # finalize-only lane-offset store (once per dst tile, not per src tile)
                out_ref[:, h * out_feats:(h + 1) * out_feats] = v.astype(out_ref.dtype)


# ---------------------------------------------------------------------------
# Block-sparsity schedule (computed ONCE per graph, reused by every layer).
# ---------------------------------------------------------------------------
def build_block_schedule(adj_pad, block):
    n_pad = adj_pad.shape[0]
    nb = n_pad // block
    blk_nz = (adj_pad.reshape(nb, block, nb, block) != 0).any(axis=(1, 3))   # (nb_dst, nb_src)
    counts = jnp.sum(blk_nz, axis=1).astype(jnp.int32)                        # (nb,)
    j = jnp.arange(nb, dtype=jnp.int32)
    keys = jnp.where(blk_nz, j[None, :], nb + j[None, :])                     # unique keys/row
    order = jnp.argsort(keys, axis=1).astype(jnp.int32)                       # non-empty first
    last = jnp.take_along_axis(order, jnp.maximum(counts - 1, 0)[:, None], axis=1)
    src_ids = jnp.where(j[None, :] < counts[:, None], order, last)            # repeat => no DMA
    # NOTE: SMEM arrays kept 1-D to avoid 2-D SMEM padding blow-up.
    return src_ids.reshape(-1).astype(jnp.int32), counts


# ---------------------------------------------------------------------------
# One GATConv layer (all heads).
# ---------------------------------------------------------------------------
def gat_conv(h_pad, w, attn_l, attn_r, adj_pad, src_ids, counts, *,
             apply_elu, mean_heads, block=256):
    num_heads, d_in, f_out = w.shape
    n_pad, d_in_pad = h_pad.shape
    nb = n_pad // block
    assert n_pad % block == 0 and d_in_pad % 128 == 0
    assert d_in_pad >= d_in and 2 * num_heads <= 128

    hf = num_heads * f_out
    hf_pad = _round_up(hf, 128)
    p_cols = hf_pad + 128

    # ---- pack weights (wrapper-side, constant prep) ----
    w_all = jnp.transpose(w, (1, 0, 2)).reshape(d_in, hf)          # col h*F+f = W[h,:,f]
    w_all = jnp.pad(w_all, ((0, d_in_pad - d_in), (0, hf_pad - hf)))
    w_l = jnp.einsum('hdf,hf->dh', w, attn_l[:, 0, :])             # source-term columns
    w_r = jnp.einsum('hdf,hf->dh', w, attn_r[:, 0, :])             # dest-term columns
    w_sc = jnp.concatenate([w_l, w_r], axis=1)
    w_sc = jnp.pad(w_sc, ((0, d_in_pad - d_in), (0, 128 - 2 * num_heads)))
    w_ext = jnp.concatenate([w_all, w_sc], axis=1).astype(jnp.bfloat16)

    # ---- kernel 1: projection (+ fused attention-vector terms) ----
    z, s = pl.pallas_call(
        functools.partial(project_kernel, hf_pad=hf_pad),
        out_shape=(jax.ShapeDtypeStruct((n_pad, hf_pad), jnp.bfloat16),
                   jax.ShapeDtypeStruct((n_pad, 128), jnp.float32)),
        grid=(nb,),
        in_specs=[pl.BlockSpec((block, d_in_pad), lambda i: (i, 0)),
                  pl.BlockSpec((d_in_pad, p_cols), lambda i: (0, 0))],
        out_specs=(pl.BlockSpec((block, hf_pad), lambda i: (i, 0)),
                   pl.BlockSpec((block, 128), lambda i: (i, 0))),
        compiler_params=pltpu.CompilerParams(dimension_semantics=("parallel",)),
    )(h_pad.astype(jnp.bfloat16), w_ext)

    # Source attention term transposed ONCE (layout plumbing) -> lane-oriented rows.
    el_t = jnp.transpose(s[:, :num_heads])                          # (H, N_pad) f32

    if mean_heads:
        out_width, out_dtype = f_out, jnp.float32       # final layer: exact-width output
    else:
        out_width, out_dtype = hf_pad, jnp.bfloat16     # hidden layer: feeds next projection

    # ---- kernel 2: block-sparse tiled masked softmax + aggregation ----
    # TODO(synk): add pipeline_mode=pl.Buffered(3) on adj/z if profiling shows exposed DMA
    # in the small-H mean_heads layer.
    out = pl.pallas_call(
        functools.partial(gat_attn_kernel, num_heads=num_heads, out_feats=f_out,
                          apply_elu=apply_elu, mean_heads=mean_heads,
                          exp_dtype=_exp_dtype()),
        out_shape=jax.ShapeDtypeStruct((n_pad, out_width), out_dtype),
        grid_spec=pltpu.PrefetchScalarGridSpec(
            num_scalar_prefetch=2,
            grid=(nb, nb),                                           # (dst, src): reduction last
            in_specs=[
                pl.BlockSpec((block, block),                         # adj tile (int8), gathered
                             lambda di, si, sid, cnt: (di, sid[di * nb + si])),
                pl.BlockSpec((block, hf_pad),                        # z (src rows), gathered
                             lambda di, si, sid, cnt: (sid[di * nb + si], 0)),
                pl.BlockSpec((block, 128),                           # [el|er] (dst rows)
                             lambda di, si, sid, cnt: (di, 0)),
                pl.BlockSpec((num_heads, block),                     # el^T (src cols), gathered
                             lambda di, si, sid, cnt: (0, sid[di * nb + si])),
            ],
            out_specs=pl.BlockSpec((block, out_width),
                                   lambda di, si, sid, cnt: (di, 0)),
            scratch_shapes=[pltpu.VMEM((num_heads, block, 1), jnp.float32),       # running max
                            pltpu.VMEM((num_heads, block, 1), jnp.float32),       # running denom
                            pltpu.VMEM((num_heads, block, f_out), jnp.float32)],  # per-head acc
        ),
        compiler_params=pltpu.CompilerParams(
            dimension_semantics=("parallel", "arbitrary")),
    )(src_ids, counts, adj_pad, z, s, el_t)
    return out


def init_gat_params(key, in_feats, hidden_feats, out_feats, num_heads, num_layers):
    """Deterministic (xavier-ish) parameter init mirroring GAT.__init__ shapes."""
    dims_in = [in_feats]
    dims_out = [hidden_feats]
    heads = [num_heads[0]]
    for l in range(1, num_layers):
        dims_in.append(hidden_feats * num_heads[l - 1])
        dims_out.append(hidden_feats)
        heads.append(num_heads[l])
    dims_in.append(hidden_feats * num_heads[-2])
    dims_out.append(out_feats)
    heads.append(num_heads[-1])

    params = []
    for din, dout, h in zip(dims_in, dims_out, heads):
        key, kw, kl, kr = jax.random.split(key, 4)
        scale = jnp.sqrt(2.0 / (din + dout))
        w = scale * jax.random.normal(kw, (h, din, dout), jnp.float32)
        al = 0.1 * jax.random.normal(kl, (h, 1, dout), jnp.float32)
        ar = 0.1 * jax.random.normal(kr, (h, 1, dout), jnp.float32)
        params.append((w, al, ar))
    return params


def gat_forward(params, features, adj, num_layers, *, block=256):
    n, d_in = features.shape
    # Pad node count to an EVEN number of dst tiles so the "parallel" dst axis splits evenly
    # across v7x's 2 TensorCores (harmless on v5e/v6e; empty blocks are skipped anyway).
    n_pad = _round_up(n, 2 * block)
    d_pad = _round_up(d_in, 128)
    h = jnp.pad(features, ((0, n_pad - n), (0, d_pad - d_in)))
    adj_p = jnp.pad(adj, ((0, n_pad - n), (0, n_pad - n))).astype(jnp.int8)   # int8 mask stream
    src_ids, counts = build_block_schedule(adj_p, block)                      # reused per layer
    for l in range(num_layers):
        w, al, ar = params[l]
        h = gat_conv(h, w, al, ar, adj_p, src_ids, counts,
                     apply_elu=True, mean_heads=False, block=block)
    w, al, ar = params[-1]
    out = gat_conv(h, w, al, ar, adj_p, src_ids, counts,
                   apply_elu=False, mean_heads=True, block=block)
    return out[:n, :w.shape[2]]


# ---------------------------------------------------------------------------
# Pure-JAX f32 reference (DGL GATConv semantics) for correctness checking.
# ---------------------------------------------------------------------------
def _gat_conv_ref(h, w, al, ar, adj, *, apply_elu, mean_heads):
    z = jnp.einsum('nd,hdf->hnf', h, w)                 # (H, N, F)
    el = jnp.sum(z * al, axis=-1)                       # (H, N) source term
    er = jnp.sum(z * ar, axis=-1)                       # (H, N) dest term
    e = er[:, :, None] + el[:, None, :]                 # (H, dst, src)
    e = jnp.where(e > 0, e, 0.2 * e)
    e = jnp.where(adj[None, :, :] > 0, e, -jnp.inf)
    a = jax.nn.softmax(e, axis=-1)
    out = jnp.einsum('hds,hsf->hdf', a, z)
    if mean_heads:
        res = jnp.mean(out, axis=0)
    else:
        res = jnp.transpose(out, (1, 0, 2)).reshape(h.shape[0], -1)
    if apply_elu:
        res = jnp.where(res > 0, res, jnp.exp(res) - 1.0)
    return res


def gat_forward_ref(params, features, adj, num_layers):
    h = features
    for l in range(num_layers):
        w, al, ar = params[l]
        h = _gat_conv_ref(h, w, al, ar, adj, apply_elu=True, mean_heads=False)
    w, al, ar = params[-1]
    return _gat_conv_ref(h, w, al, ar, adj, apply_elu=False, mean_heads=True)


if __name__ == "__main__":
    N = 16
    in_feats, hidden_feats, out_feats = 8, 8, 4
    num_layers = 2
    num_heads = [2, 2, 2]

    key = jax.random.PRNGKey(0)
    k_adj, k_feat, k_params = jax.random.split(key, 3)

    # deterministic random graph with self-loops (adj[d, s] = 1 iff edge s -> d)
    adj = (jax.random.uniform(k_adj, (N, N)) < 0.3).astype(jnp.float32)
    adj = jnp.maximum(adj, jnp.eye(N, dtype=jnp.float32))

    features = jax.random.normal(k_feat, (N, in_feats), jnp.float32)

    params = init_gat_params(k_params, in_feats, hidden_feats, out_feats,
                             num_heads, num_layers)

    # block=128 keeps the padded toy graph small (use 256 in production; sweep 512 on v6e/v7x).
    logits = gat_forward(params, features, adj, num_layers, block=128)
    logits = jax.block_until_ready(logits)

    ref = gat_forward_ref(params, features, adj, num_layers)

    assert logits.shape == (N, out_feats)
    assert bool(jnp.all(jnp.isfinite(logits)))
    max_err = float(jnp.max(jnp.abs(logits - ref)))
    assert max_err < 0.2, f"mismatch vs f32 reference: max abs err {max_err}"
    print("KERNEL_OK")
</pallas_src>

<mosaic_0001>
module attributes {stable_mosaic.version = 11 : i64} {
  func.func @project_kernel(%arg0: i32, %arg1: memref<128x128xbf16, #tpu.memory_space<vmem>>, %arg2: memref<128x256xbf16, #tpu.memory_space<vmem>>, %arg3: memref<128x128xbf16, #tpu.memory_space<vmem>>, %arg4: memref<128x128xf32, #tpu.memory_space<vmem>>) attributes {dimension_semantics = [#tpu.dimension_semantics<parallel>], iteration_bounds = array<i64: 2>, scalar_prefetch = 0 : i64, scratch_operands = 0 : i64, tpu.core_type = #tpu.core_type<tc>, window_params = [{transform_indices = @transform_0, window_bounds = array<i64: 128, 128>}, {pipeline_mode = #tpu.pipeline_mode<synchronous>, transform_indices = @transform_1, window_bounds = array<i64: 128, 256>}, {transform_indices = @transform_2, window_bounds = array<i64: 128, 128>}, {transform_indices = @transform_3, window_bounds = array<i64: 128, 128>}]} {
    %c0 = arith.constant 0 : index
    %c0_0 = arith.constant 0 : index
    %0 = vector.load %arg1[%c0, %c0_0] : memref<128x128xbf16, #tpu.memory_space<vmem>>, vector<128x128xbf16>
    %c0_1 = arith.constant 0 : index
    %c0_2 = arith.constant 0 : index
    %1 = vector.load %arg2[%c0_1, %c0_2] : memref<128x256xbf16, #tpu.memory_space<vmem>>, vector<128x256xbf16>
    %cst = arith.constant dense<0.000000e+00> : vector<128x256xf32>
    %2 = tpu.matmul %0, %1, %cst {dimension_numbers = #tpu.dot_dimension_numbers<[1], [0], [0], [1], [0, 0, 1, 1], [], []>} : vector<128x128xbf16>, vector<128x256xbf16>, vector<128x256xf32> -> vector<128x256xf32>
    %3 = vector.extract_strided_slice %2 {offsets = [0, 0], sizes = [128, 128], strides = [1, 1]} : vector<128x256xf32> to vector<128x128xf32>
    %4 = arith.truncf %3 : vector<128x128xf32> to vector<128x128xbf16>
    %c0_3 = arith.constant 0 : index
    %c0_4 = arith.constant 0 : index
    %5 = vector.load %arg3[%c0_3, %c0_4] : memref<128x128xbf16, #tpu.memory_space<vmem>>, vector<128x128xbf16>
    tpu.vector_store %arg3[%c0_3, %c0_4], %4 {strides = array<i32>} : memref<128x128xbf16, #tpu.memory_space<vmem>>, vector<128x128xbf16>,
    %6 = vector.extract_strided_slice %2 {offsets = [0, 128], sizes = [128, 128], strides = [1, 1]} : vector<128x256xf32> to vector<128x128xf32>
    %c0_5 = arith.constant 0 : index
    %c0_6 = arith.constant 0 : index
    %7 = vector.load %arg4[%c0_5, %c0_6] : memref<128x128xf32, #tpu.memory_space<vmem>>, vector<128x128xf32>
    tpu.vector_store %arg4[%c0_5, %c0_6], %6 {strides = array<i32>} : memref<128x128xf32, #tpu.memory_space<vmem>>, vector<128x128xf32>,
    return
  }
  func.func @transform_0(%arg0: i32) -> (i32, i32) {
    %c0_i32 = arith.constant 0 : i32
    %c0_i32_0 = arith.constant 0 : i32
    return %arg0, %c0_i32 : i32, i32
  }
  func.func @transform_1(%arg0: i32) -> (i32, i32) {
    %c0_i32 = arith.constant 0 : i32
    %c0_i32_0 = arith.constant 0 : i32
    %c0_i32_1 = arith.constant 0 : i32
    return %c0_i32, %c0_i32_0 : i32, i32
  }
  func.func @transform_2(%arg0: i32) -> (i32, i32) {
    %c0_i32 = arith.constant 0 : i32
    %c0_i32_0 = arith.constant 0 : i32
    return %arg0, %c0_i32 : i32, i32
  }
  func.func @transform_3(%arg0: i32) -> (i32, i32) {
    %c0_i32 = arith.constant 0 : i32
    %c0_i32_0 = arith.constant 0 : i32
    return %arg0, %c0_i32 : i32, i32
  }
}

</mosaic_0001>

<bundles_post_ra>
// kernel: tpu_custom_call.1
= control target key start
LH: loop header
LB: loop body
LE: loop exit
PB: predicated region body
PF: predicated region fallthrough
CT: control target
= control target key end

     0   :  { %9 = vsyncpa [#allocation3], 0  ;;  %s1431_s0 = inlined_call_operand.hbm [shape: bf16[256,128], index: 0, kind: input, shape index: {}]   ;;  %s1432_s1 = inlined_call_operand.hbm [shape: bf16[128,256], index: 1, kind: input, shape index: {}]   ;;  %s1433_s2 = inlined_call_operand.hbm [shape: bf16[256,128], index: 2, kind: output, shape index: {0}]   ;;  %s1434_s3 = inlined_call_operand.hbm [shape: f32[256,128], index: 3, kind: output, shape index: {1}]  }
   0x1   :  { %11 = vsyncpa [#allocation3 + $0x1], 0 }
   0x2   :  { %12 = vsyncpa [#allocation6], 0 }
   0x3   :  { %13 = vsyncpa [#allocation4], 0 }
   0x4   :  { %15 = vsyncpa [#allocation4 + $0x1], 0 }
   0x5   :  { %16 = vsyncpa [#allocation9], 0 }
   0x6   :  { %18 = vsyncpa [#allocation9 + $0x1], 0  ;;  %s1170_s12 = smov 0   ;;  %s1172_s13 = smov 0  }
   0x7   :  { %s1174_s14 = smov 0   ;;  %s1176_s15 = smov 0  }
   0x8 LB: > { %s1191_s16 = sadd.s32 4294967295, %s1135_s15   ;;  %s738_s17 = sadd.s32 4294967294, %s1135_s15   ;;  %s1135_s15 = sphi %s1176_s15, %s1456_s15   ;;  %s1131_s14 = sphi %s1174_s14, %s1455_s14   ;;  %s1127_s13 = sphi %s1172_s13, %s1454_s13   ;;  %s1123_s12 = sphi %s1170_s12, %s1453_s12  }
   0x9   : > { %p44_p0 = scmp.ne.s32.totalorder %s1127_s13, %s1123_s12  ;;  %p1435_p1 = scmp.eq.s32.totalorder %s1191_s16, 0 }
   0xa   : > { %p95_p3 = scmp.eq.s32.totalorder %s738_s17, 1  ;;  %p739_p5 = scmp.ge.s32.totalorder %s1135_s15, 1 }
   0xb   : > { %p1200_p4 = por %p1435_p1, %p44_p0  ;;  %p128_p7 = scmp.lt.s32.totalorder %s1135_s15, 3 }
   0xc   : > { %p1205_p6 = por %p95_p3, %p44_p0  ;;  %s1137_s21 = smov [#allocation5]  }
   0xd   : > { %s1439_s18 = scalar_select %p1200_p4, 1, 0 }
   0xe   : > { %s1440_s19 = scalar_select %p1205_p6, 1, 0 }
   0xf   : > { %p1210_p8 = pnand %p739_p5, %p128_p7  ;;  %s140_s22 = sshll.u32 %s1137_s21, 4  ;;  %s141_s22 = int_to_ptr.vmem [resolvable:$true] %s140_s22 }
  0x10   : > { %s1224_s24 = sadd.s32 1, %s1135_s15   ;;  %s31_s25 = sadd.s32 1, %s1131_s14 }
  0x11   : > { %s1441_s20 = scalar_select %p1210_p8, 1, 0 }
  0x12   : > { %p890_p9 = pneg %p1210_p8  ;;  %s28_s26 = ssub.s32 %s1135_s15, %s1224_s24 }
  0x13   : > { %s994_s27 = scalar_lea.vmem %s141_s22, 2048  ;;  %p1002_p5 = scmp.lt.s32.totalorder %s141_s22, %s141_s22 }
  0x14   : > { %p1219_p11 = pnand %p890_p9, %p1435_p1  ;;  %p995_p13 = scmp.ne.s32.totalorder %s141_s22, %s994_s27 }
  0x15   : > { %p1003_p7 = scmp.lt.s32.totalorder %s994_s27, %s994_s27 }
  0x16   : > { %p985_p12 = pneg %p1219_p11 }
  0x17   : > { %p1004_p10 = por %p1003_p7, %p1002_p5 }
  0x18   : > { %p997_p0 = pnand %p995_p13, %p985_p12 }
  0x1a   : > { %p998_p3 = pneg %p997_p0 }
  0x1c   : > { %p1005_p2 = pnand %p1004_p10, %p998_p3 }
  0x1e   : > { %1008 = shalt.err (!%p1005_p2)
}
  0x1f   : > { %s1138_s28 = smov 128   ;;  %s1139_s29 = smov 8  }
  0x20   : > { %893 = dma.hbm_to_vmem [thread:$0]  (!%p1219_p11), %s1432_s1, 2048, %s141_s22, [#allocation6], %s1138_s28, %s1138_s28, %s1139_s29  }
  0x21   : > { %p29_p9 = scmp.eq.s32.totalorder %s28_s26, 0  ;;  %p38_p12 = scmp.ne.s32.totalorder %s1131_s14, %s1127_s13 }
  0x22   : > { %p39_p10 = scmp.eq.s32.totalorder %s1135_s15, 0  ;;  %p906_p2 = scmp.lt.s32.totalorder %s1135_s15, 2 }
  0x23   : > { %s1241_s5 = scalar_select %p29_p9, %s1131_s14, %s31_s25  }
  0x24   : > { %p40_p13 = por %p39_p10, %p38_p12  ;;  %p1443_p0 = scmp.eq.s32.totalorder %s1191_s16, 1 }
  0x25   : > { %s154_s7 = sand.u32 1, %s1131_s14   ;;  %s798_s8 = sshll.u32 %s1135_s15, 10 }
  0x26   : > { %p1245_p3 = por %p1443_p0, %p38_p12  ;;  %s742_s9 = sshll.u32 %s154_s7, 6 }
  0x27   : > { %s1254_s17 = scalar_lea.hbm %s1431_s0, %s798_s8  ;;  %s158_s21 = scalar_lea.vmem [#allocation2], %s742_s9 }
  0x28   : > { %s1444_s6 = scalar_select %p1245_p3, 1, 0 }
  0x29   : > { %s165_s22 = sshll.u32 %s158_s21, 4  ;;  %p1256_p11 = pnand %p906_p2, %p40_p13  ;;  %s1260_s22 = int_to_ptr.vmem [resolvable:$true] %s165_s22 }
  0x2a   : > { %s1262_s25 = scalar_lea.sflag [#allocation3], %s154_s7  ;;  %s1009_s26 = scalar_lea.hbm %s1254_s17, 1024 }
  0x2b   : > { %p1010_p5 = scmp.ne.s32.totalorder %s1254_s17, %s1009_s26  ;;  %p1011_p7 = pneg %p1256_p11 }
  0x2c   : > { %s1014_s29 = scalar_lea.hbm %s1431_s0, 2048  ;;  %p1015_p10 = scmp.lt.s32.totalorder %s1254_s17, %s1431_s0 }
  0x2d   : > { %p1012_p9 = pnand %p1011_p7, %p1010_p5  ;;  %p1016_p2 = scmp.lt.s32.totalorder %s1014_s29, %s1009_s26 }
  0x2f   : > { %p1013_p12 = pneg %p1012_p9  ;;  %p1017_p13 = por %p1016_p2, %p1015_p10 }
  0x31   : > { %p1018_p0 = pnand %p1017_p13, %p1013_p12 }
  0x33   : > { %1021 = shalt.err (!%p1018_p0)
}
  0x34   : > { %s1022_s7 = scalar_lea.vmem %s1260_s22, 1024  ;;  %s1140_s8 = smov [#allocation2]  }
  0x35   : > { %p1023_p1 = scmp.ne.s32.totalorder %s1260_s22, %s1022_s7  ;;  %s1027_s9 = sshll.u32 %s1140_s8, 4  ;;  %s1028_s9 = int_to_ptr.vmem [resolvable:$false] %s1027_s9 }
  0x36   : > { %s1029_s10 = scalar_lea.vmem %s1028_s9, 2048  ;;  %p1030_p9 = scmp.lt.s32.totalorder %s1260_s22, %s1028_s9 }
  0x37   : > { %p1025_p6 = pnand %p1023_p1, %p1011_p7  ;;  %p1031_p3 = scmp.lt.s32.totalorder %s1029_s10, %s1022_s7 }
  0x39   : > { %p1026_p5 = pneg %p1025_p6  ;;  %p1032_p4 = por %p1031_p3, %p1030_p9 }
  0x3b   : > { %p1033_p8 = pnand %p1032_p4, %p1026_p5 }
  0x3d   : > { %1036 = shalt.err (!%p1033_p8)
}
  0x3e   : > { %s1141_s11 = smov 64   ;;  %s1142_s21 = smov 4  }
  0x3f   : > { %897 = dma.hbm_to_vmem [thread:$0]  (!%p1256_p11), %s1254_s17, 1024, %s1260_s22, %s1262_s25, %s1141_s11, %s1141_s11, %s1142_s21  }
  0x40   : > { %p1446_p1 = scmp.ne.s32.totalorder %s1441_s20, 0 }
  0x41   : > { %s1286_s26 = sand.u32 (!%p1446_p1), 1, %s1127_s13   ;;  %p1447_p4 = scmp.ne.s32.totalorder (!%p1446_p1), %s1439_s18, 0 }
  0x42   : > { %177 = sbr.rel (%p1446_p1) target bundleno = 370 (0x172), region = 28  ;;  %s746_s27 = sshll.u32 (!%p1446_p1), %s1286_s26, 6 }
  0x43   : > { %s180_s28 = scalar_lea.sflag (!%p1446_p1), [#allocation3], %s1286_s26  ;;  %s1292_s29 = scalar_lea.vmem (!%p1446_p1), [#allocation2], %s746_s27 }
  0x47   : > { %1106 = dma.done.wait (%p1447_p4), %s180_s28, 1024  }
  0x48   : > { %1108 = vsyncadd (%p1447_p4), %s180_s28, 4294966272  ;;  %p1448_p6 = scmp.eq.s32.totalorder %s1191_s16, 0 }
  0x4a   : > { %1110 = dma.done.wait (%p1448_p6), [#allocation6], 2048   ;;  %p1449_p8 = pmov %p1448_p6 }
  0x4b   : > { %v1143_v0 = vmov 0   ;;  %v951_v1 = vld [vmem:[#allocation5 + $0x74] ss:$8 sps:$4 sm:$0xff]   ;;  %v953_v2 = vld [vmem:[#allocation5 + $0x70] ss:$8 sps:$4 sm:$0xff]   ;;  %v975_v17 = vld [vmem:[%s1292_s29] sm:$0xff]  }
  0x4c   : > { %1112 = vsyncadd (%p1449_p8), [#allocation6], 4294965248  ;;  %411 = vmatprep.mubr.bf16.mxu0 %v1143_v0  ;;  %451 = vmatprep.mubr.bf16.mxu1 %v1143_v0  ;;  %v954_v3 = vld [vmem:[#allocation5 + $0x64] ss:$8 sps:$4 sm:$0xff]   ;;  %v956_v4 = vld [vmem:[#allocation5 + $0x60] ss:$8 sps:$4 sm:$0xff]  }
  0x4d   : > { %379 = vmatprep.subr.bf16.mxu0 %v951_v1  ;;  %864 = vmatprep.subr.bf16.mxu1 %v951_v1  ;;  %v957_v5 = vld [vmem:[#allocation5 + $0x54] ss:$8 sps:$4 sm:$0xff]   ;;  %v959_v6 = vld [vmem:[#allocation5 + $0x50] ss:$8 sps:$4 sm:$0xff]   ;;  %v960_v7 = vld [vmem:[#allocation5 + $0x44] ss:$8 sps:$4 sm:$0xff]  }
  0x4e   : > { %380 = vmatpush1.bf16.msra.mxu0 %v953_v2  ;;  %872 = vmatpush1.bf16.msra.mxu1 %v953_v2  ;;  %v962_v8 = vld [vmem:[#allocation5 + $0x40] ss:$8 sps:$4 sm:$0xff]   ;;  %v963_v9 = vld [vmem:[#allocation5 + $0x34] ss:$8 sps:$4 sm:$0xff]   ;;  %v965_v10 = vld [vmem:[#allocation5 + $0x30] ss:$8 sps:$4 sm:$0xff]  }
  0x4f   : > { %381 = vmatprep.subr.bf16.mxu0 %v954_v3  ;;  %865 = vmatprep.subr.bf16.mxu1 %v954_v3  ;;  %v966_v11 = vld [vmem:[#allocation5 + $0x24] ss:$8 sps:$4 sm:$0xff]   ;;  %v968_v12 = vld [vmem:[#allocation5 + $0x20] ss:$8 sps:$4 sm:$0xff]   ;;  %v969_v13 = vld [vmem:[#allocation5 + $0x14] ss:$8 sps:$4 sm:$0xff]  }
  0x50   : > { %v971_v14 = vld [vmem:[#allocation5 + $0x10] ss:$8 sps:$4 sm:$0xff]   ;;  %v972_v15 = vld [vmem:[#allocation5 + $0x4] ss:$8 sps:$4 sm:$0xff]   ;;  %v974_v16 = vld [vmem:[#allocation5] ss:$8 sps:$4 sm:$0xff]  }
  0x51   : > { %v976_v18 = vld [vmem:[%s1292_s29 + $0x20] sm:$0xff]   ;;  %v977_v19 = vld [vmem:[%s1292_s29 + $0x8] sm:$0xff]   ;;  %v979_v21 = vld [vmem:[%s1292_s29 + $0x10] sm:$0xff]   ;;  %s749_s18 = sshll.u32 %s1286_s26, 7  ;;  %s1325_s17 = scalar_lea.vmem [#allocation7], %s746_s27 }
  0x52   : > { %382 = vmatpush1.bf16.msra.mxu0 %v956_v4  ;;  %873 = vmatpush1.bf16.msra.mxu1 %v956_v4  ;;  %v978_v20 = vld [vmem:[%s1292_s29 + $0x28] sm:$0xff]   ;;  %v980_v22 = vld [vmem:[%s1292_s29 + $0x30] sm:$0xff]   ;;  %v981_v23 = vld [vmem:[%s1292_s29 + $0x18] sm:$0xff]   ;;  %s1319_s20 = scalar_lea.vmem [#allocation8], %s749_s18  ;;  %s607_s22 = sshll.u32 %s1325_s17, 4  ;;  %s1345_s22 = int_to_ptr.vmem [resolvable:$true] %s607_s22 }
  0x53   : > { %383 = vmatprep.subr.bf16.mxu0 %v957_v5  ;;  %866 = vmatprep.subr.bf16.mxu1 %v957_v5  ;;  %v982_v24 = vld [vmem:[%s1292_s29 + $0x38] sm:$0xff]   ;;  %s815_s23 = sshll.u32 %s1191_s16, 10  ;;  %s816_s25 = sshll.u32 %s1191_s16, 11 }
  0x54   : > { %s1351_s7 = scalar_lea.hbm %s1433_s2, %s815_s23  ;;  %s623_s8 = sshll.u32 %s1319_s20, 4  ;;  %s1361_s8 = int_to_ptr.vmem [resolvable:$true] %s623_s8 }
  0x55   : > { %s1359_s10 = scalar_lea.hbm %s1434_s3, %s816_s25  ;;  %s589_s11 = scalar_lea.sflag [#allocation4], %s1286_s26 }
  0x56   : > { %384 = vmatpush1.bf16.msra.mxu0 %v959_v6  ;;  %874 = vmatpush1.bf16.msra.mxu1 %v959_v6  ;;  %s1037_s21 = scalar_lea.vmem %s1345_s22, 1024  ;;  %p1450_p11 = scmp.ne.s32.totalorder %s1444_s6, 0 }
  0x57   : > { %385 = vmatprep.subr.bf16.mxu0 %v960_v7  ;;  %867 = vmatprep.subr.bf16.mxu1 %v960_v7  ;;  %p1038_p3 = scmp.ne.s32.totalorder %s1345_s22, %s1037_s21  ;;  %s1144_s27 = smov [#allocation7]  }
  0x58   : > { %s1041_s28 = sshll.u32 %s1144_s27, 4  ;;  %s1042_s28 = int_to_ptr.vmem [resolvable:$false] %s1041_s28 }
  0x59   : > { %p1039_p7 = pnand %p1038_p3, %p1450_p11  ;;  %s1043_s29 = scalar_lea.vmem %s1042_s28, 2048 }
  0x5a   : > { %386 = vmatpush1.bf16.msra.mxu0 %v962_v8  ;;  %875 = vmatpush1.bf16.msra.mxu1 %v962_v8  ;;  %p1044_p10 = scmp.lt.s32.totalorder %s1345_s22, %s1042_s28  ;;  %p1045_p2 = scmp.lt.s32.totalorder %s1043_s29, %s1037_s21 }
  0x5b   : > { %387 = vmatprep.subr.bf16.mxu0 %v963_v9  ;;  %868 = vmatprep.subr.bf16.mxu1 %v963_v9  ;;  %p1040_p12 = pneg %p1039_p7 }
  0x5c   : > { %p1046_p13 = por %p1045_p2, %p1044_p10 }
  0x5e   : > { %388 = vmatpush1.bf16.msra.mxu0 %v965_v10  ;;  %876 = vmatpush1.bf16.msra.mxu1 %v965_v10  ;;  %p1047_p0 = pnand %p1046_p13, %p1040_p12 }
  0x5f   : > { %389 = vmatprep.subr.bf16.mxu0 %v966_v11  ;;  %869 = vmatprep.subr.bf16.mxu1 %v966_v11 }
  0x62   : > { %390 = vmatpush1.bf16.msra.mxu0 %v968_v12  ;;  %877 = vmatpush1.bf16.msra.mxu1 %v968_v12 }
  0x63   : > { %391 = vmatprep.subr.bf16.mxu0 %v969_v13  ;;  %870 = vmatprep.subr.bf16.mxu1 %v969_v13 }
  0x66   : > { %392 = vmatpush1.bf16.msra.mxu0 %v971_v14  ;;  %878 = vmatpush1.bf16.msra.mxu1 %v971_v14 }
  0x67   : > { %393 = vmatprep.subr.bf16.mxu0 %v972_v15  ;;  %871 = vmatprep.subr.bf16.mxu1 %v972_v15 }
  0x6a   : > { %394 = vmatpush1.bf16.msra.mxu0 %v974_v16  ;;  %879 = vmatpush1.bf16.msra.mxu1 %v974_v16 }
  0x6d   : > { %412 = vmatmul.mubr.bf16.vlgmr.msra.gmra.mxu0 %v975_v17  ;;  %452 = vmatmul.mubr.bf16.vlgmr.msra.gmra.mxu1 %v976_v18 }
  0x6e   : > { %421 = vmatprep.mubr.bf16.mxu0 %v1143_v0  ;;  %461 = vmatprep.mubr.bf16.mxu1 %v1143_v0 }
  0x75   : > { %422 = vmatmul.mubr.bf16.gmra.mxu0 %v977_v19  ;;  %462 = vmatmul.mubr.bf16.gmra.mxu1 %v978_v20 }
  0x76   : > { %431 = vmatprep.mubr.bf16.mxu0 %v1143_v0  ;;  %471 = vmatprep.mubr.bf16.mxu1 %v1143_v0 }
  0x7d   : > { %432 = vmatmul.mubr.bf16.gmra.mxu0 %v979_v21  ;;  %472 = vmatmul.mubr.bf16.gmra.mxu1 %v980_v22 }
  0x7e   : > { %441 = vmatprep.mubr.bf16.mxu0 %v1143_v0  ;;  %481 = vmatprep.mubr.bf16.mxu1 %v1143_v0 }
  0x85   : > { %442 = vmatmul.mubr.bf16.gmra.mxu0 %v981_v23  ;;  %482 = vmatmul.mubr.bf16.gmra.mxu1 %v982_v24 }
 0x12d   : > { %v413_v25 = vpop.f32.mrf.mxu0  ;;  %v453_v26 = vpop.f32.mrf.mxu1 }
 0x12f   : > { %v415_v27 = vpop.f32.mrf.mxu0  ;;  %v455_v28 = vpop.f32.mrf.mxu1 }
 0x130   : > { %572 = vst [vmem:[%s1319_s20] sm:$0xff] %v415_v27  ;;  %580 = vst [vmem:[%s1319_s20 + $0x40] sm:$0xff] %v455_v28 }
 0x131   : > { %v417_v29 = vpop.f32.mrf.mxu0  ;;  %v457_v30 = vpop.f32.mrf.mxu1 }
 0x132   : > { %v820_v31 = vpack.c.bf16 %v417_v29, %v413_v25  ;;  %v840_v32 = vpack.c.bf16 %v457_v30, %v453_v26 }
 0x133   : > { %v419_v33 = vpop.f32.mrf.mxu0  ;;  %v459_v34 = vpop.f32.mrf.mxu1 }
 0x134   : > { %821 = vst [vmem:[%s1325_s17] sm:$0xff] %v820_v31   ;;  %860 = vst [vmem:[%s1325_s17 + $0x20] sm:$0xff] %v840_v32  }
 0x135   : > { %573 = vst [vmem:[%s1319_s20 + $0x8] sm:$0xff] %v419_v33  ;;  %581 = vst [vmem:[%s1319_s20 + $0x48] sm:$0xff] %v459_v34  ;;  %v423_v35 = vpop.f32.mrf.mxu0  ;;  %v463_v36 = vpop.f32.mrf.mxu1 }
 0x137   : > { %v425_v37 = vpop.f32.mrf.mxu0  ;;  %v465_v38 = vpop.f32.mrf.mxu1 }
 0x138   : > { %574 = vst [vmem:[%s1319_s20 + $0x10] sm:$0xff] %v425_v37  ;;  %582 = vst [vmem:[%s1319_s20 + $0x50] sm:$0xff] %v465_v38 }
 0x139   : > { %v427_v39 = vpop.f32.mrf.mxu0  ;;  %v467_v40 = vpop.f32.mrf.mxu1 }
 0x13a   : > { %v825_v41 = vpack.c.bf16 %v427_v39, %v423_v35  ;;  %v845_v42 = vpack.c.bf16 %v467_v40, %v463_v36 }
 0x13b   : > { %v429_v43 = vpop.f32.mrf.mxu0  ;;  %v469_v44 = vpop.f32.mrf.mxu1 }
 0x13c   : > { %857 = vst [vmem:[%s1325_s17 + $0x8] sm:$0xff] %v825_v41   ;;  %861 = vst [vmem:[%s1325_s17 + $0x28] sm:$0xff] %v845_v42  }
 0x13d   : > { %575 = vst [vmem:[%s1319_s20 + $0x18] sm:$0xff] %v429_v43  ;;  %583 = vst [vmem:[%s1319_s20 + $0x58] sm:$0xff] %v469_v44  ;;  %v433_v45 = vpop.f32.mrf.mxu0  ;;  %v473_v46 = vpop.f32.mrf.mxu1 }
 0x13f   : > { %v435_v47 = vpop.f32.mrf.mxu0  ;;  %v475_v48 = vpop.f32.mrf.mxu1 }
 0x140   : > { %576 = vst [vmem:[%s1319_s20 + $0x20] sm:$0xff] %v435_v47  ;;  %584 = vst [vmem:[%s1319_s20 + $0x60] sm:$0xff] %v475_v48 }
 0x141   : > { %v437_v49 = vpop.f32.mrf.mxu0  ;;  %v477_v50 = vpop.f32.mrf.mxu1 }
 0x142   : > { %v830_v51 = vpack.c.bf16 %v437_v49, %v433_v45  ;;  %v850_v52 = vpack.c.bf16 %v477_v50, %v473_v46 }
 0x143   : > { %v439_v53 = vpop.f32.mrf.mxu0  ;;  %v479_v54 = vpop.f32.mrf.mxu1 }
 0x144   : > { %858 = vst [vmem:[%s1325_s17 + $0x10] sm:$0xff] %v830_v51   ;;  %862 = vst [vmem:[%s1325_s17 + $0x30] sm:$0xff] %v850_v52  }
 0x145   : > { %577 = vst [vmem:[%s1319_s20 + $0x28] sm:$0xff] %v439_v53  ;;  %585 = vst [vmem:[%s1319_s20 + $0x68] sm:$0xff] %v479_v54  ;;  %v443_v55 = vpop.f32.mrf.mxu0  ;;  %v483_v56 = vpop.f32.mrf.mxu1 }
 0x147   : > { %v445_v57 = vpop.f32.mrf.mxu0  ;;  %v485_v58 = vpop.f32.mrf.mxu1 }
 0x148   : > { %578 = vst [vmem:[%s1319_s20 + $0x30] sm:$0xff] %v445_v57  ;;  %586 = vst [vmem:[%s1319_s20 + $0x70] sm:$0xff] %v485_v58 }
 0x149   : > { %v447_v59 = vpop.f32.mrf.mxu0  ;;  %v487_v60 = vpop.f32.mrf.mxu1 }
 0x14a   : > { %v835_v61 = vpack.c.bf16 %v447_v59, %v443_v55  ;;  %v855_v62 = vpack.c.bf16 %v487_v60, %v483_v56 }
 0x14b   : > { %v449_v63 = vpop.f32.mrf.mxu0  ;;  %v489_v0 = vpop.f32.mrf.mxu1 }
 0x14c   : > { %859 = vst [vmem:[%s1325_s17 + $0x18] sm:$0xff] %v835_v61   ;;  %863 = vst [vmem:[%s1325_s17 + $0x38] sm:$0xff] %v855_v62  }
 0x14d   : > { %579 = vst [vmem:[%s1319_s20 + $0x38] sm:$0xff] %v449_v63  ;;  %587 = vst [vmem:[%s1319_s20 + $0x78] sm:$0xff] %v489_v0 }
 0x14e   : > { %1050 = shalt.err (!%p1047_p0)
}
 0x14f   : > { %s1051_s18 = scalar_lea.hbm %s1351_s7, 1024  ;;  %s1055_s23 = scalar_lea.hbm %s1433_s2, 2048 }
 0x150   : > { %p1052_p5 = scmp.ne.s32.totalorder %s1351_s7, %s1051_s18  ;;  %p1056_p4 = scmp.lt.s32.totalorder %s1351_s7, %s1433_s2 }
 0x151   : > { %p1057_p6 = scmp.lt.s32.totalorder %s1055_s23, %s1051_s18 }
 0x152   : > { %p1053_p9 = pnand %p1052_p5, %p1450_p11 }
 0x153   : > { %p1058_p8 = por %p1057_p6, %p1056_p4 }
 0x154   : > { %p1054_p1 = pneg %p1053_p9 }
 0x156   : > { %p1059_p3 = pnand %p1058_p8, %p1054_p1 }
 0x158   : > { %1062 = shalt.err (!%p1059_p3)
}
 0x159   : > { %s1145_s4 = smov 64   ;;  %s1146_s16 = smov 4  }
 0x15a   : > { %886 = dma.vmem_to_hbm [thread:$0]  (%p1450_p11), %s1345_s22, 1024, %s1351_s7, %s589_s11, %s1145_s4, %s1145_s4, %s1146_s16  }
 0x15b   : > { %s594_s9 = scalar_lea.sflag [#allocation9], %s1286_s26  ;;  %s1063_s21 = scalar_lea.vmem %s1361_s8, 2048 }
 0x15c   : > { %p1064_p7 = scmp.ne.s32.totalorder %s1361_s8, %s1063_s21  ;;  %s1147_s27 = smov [#allocation8]  }
 0x15d   : > { %s1067_s28 = sshll.u32 %s1147_s27, 4  ;;  %s1068_s28 = int_to_ptr.vmem [resolvable:$false] %s1067_s28 }
 0x15e   : > { %p1065_p12 = pnand %p1064_p7, %p1450_p11  ;;  %s1069_s29 = scalar_lea.vmem %s1068_s28, 4096 }
 0x15f   : > { %p1070_p2 = scmp.lt.s32.totalorder %s1361_s8, %s1068_s28  ;;  %p1071_p13 = scmp.lt.s32.totalorder %s1069_s29, %s1063_s21 }
 0x160   : > { %p1066_p10 = pneg %p1065_p12 }
 0x161   : > { %p1072_p0 = por %p1071_p13, %p1070_p2 }
 0x163   : > { %p1073_p5 = pnand %p1072_p0, %p1066_p10 }
 0x165   : > { %1076 = shalt.err (!%p1073_p5)
}
 0x166   : > { %s1077_s22 = scalar_lea.hbm %s1359_s10, 2048  ;;  %s1081_s18 = scalar_lea.hbm %s1434_s3, 4096 }
 0x167   : > { %p1078_p9 = scmp.ne.s32.totalorder %s1359_s10, %s1077_s22  ;;  %p1082_p6 = scmp.lt.s32.totalorder %s1359_s10, %s1434_s3 }
 0x168   : > { %p1083_p8 = scmp.lt.s32.totalorder %s1081_s18, %s1077_s22 }
 0x169   : > { %p1079_p1 = pnand %p1078_p9, %p1450_p11 }
 0x16a   : > { %p1084_p3 = por %p1083_p8, %p1082_p6 }
 0x16b   : > { %p1080_p4 = pneg %p1079_p1 }
 0x16d   : > { %p1085_p7 = pnand %p1084_p3, %p1080_p4 }
 0x16f   : > { %1088 = shalt.err (!%p1085_p7)
}
 0x170   : > { %s1148_s23 = smov 128   ;;  %s1149_s25 = smov 8  }
 0x171   : > { %887 = dma.vmem_to_hbm [thread:$0]  (%p1450_p11), %s1361_s8, 2048, %s1359_s10, %s594_s9, %s1148_s23, %s1148_s23, %s1149_s25  }
 0x172 PF: > { %s638_s30 = sand.u32 1, %s1123_s12   ;;  %p1451_p12 = scmp.ne.s32.totalorder %s1440_s19, 0 }
 0x173   : > { %p1452_p10 = scmp.ge.s32.totalorder %s1135_s15, 2  ;;  %s639_s4 = scalar_lea.sflag [#allocation4], %s638_s30 }
 0x175   : > { %p899_p2 = pnand %p1452_p10, %p1451_p12 }
 0x177   : > { %p900_p13 = pneg %p899_p2 }
 0x179   : > { %1114 = dma.done.wait (%p900_p13), %s639_s4, 1024  }
 0x17a   : > { %1116 = vsyncadd (%p900_p13), %s639_s4, 4294966272  ;;  %s648_s16 = scalar_lea.sflag [#allocation9], %s638_s30 }
 0x17b   : > { %1118 = dma.done.wait (%p900_p13), %s648_s16, 2048  }
 0x17c   : > { %1120 = vsyncadd (%p900_p13), %s648_s16, 4294965248  ;;  %p21_p11 = scmp.ge.s32.totalorder %s1224_s24, 4   ;;  %s1453_s12 = smov %s1127_s13 }
 0x17d   : > { %s1454_s13 = smov %s1131_s14  ;;  %s1455_s14 = smov %s1241_s5 }
 0x17e   : > { %s1456_s15 = smov %s1224_s24  ;;  %23 = sbr.rel (!%p21_p11) target bundleno = 8 (0x8), region = 94 }
 0x183   :  { %653 = vsyncpa [#allocation3], 1 }
 0x184   :  { %655 = vsyncpa [#allocation3 + $0x1], 1 }
 0x185   :  { %656 = vsyncpa [#allocation6], 1 }
 0x186   :  { %657 = vsyncpa [#allocation4], 1 }
 0x187   :  { %659 = vsyncpa [#allocation4 + $0x1], 1 }
 0x188   :  { %660 = vsyncpa [#allocation9], 1 }
 0x189   :  { %662 = vsyncpa [#allocation9 + $0x1], 1 }

</bundles_post_ra>
